<compile_context>
chip_gen: v6e
topology: v6e:2x2x1
jax: 0.10.0
libtpu: 0.0.40
codegen_flags: <defaults>
</compile_context>

<pallas_src>
import jax
import jax.numpy as jnp
from jax.experimental import pallas as pl
from jax.experimental.pallas import tpu as pltpu

_LANE = 128
_SUBLANE = 8


def _round_up(x: int, m: int) -> int:
    return ((x + m - 1) // m) * m


# --------------------------------------------------------------------------
# Parameter init (matches PyTorch: xavier_uniform_ weights, zero biases)
# --------------------------------------------------------------------------
def xavier_uniform(key, fan_in, fan_out, dtype=jnp.float32):
    """torch.nn.init.xavier_uniform_ on a (out, in) weight; returned as (in, out)."""
    limit = jnp.sqrt(6.0 / (fan_in + fan_out)).astype(dtype)
    w = jax.random.uniform(key, (fan_out, fan_in), dtype, minval=-limit, maxval=limit)
    return w.T  # forward uses x @ W with W of shape (in, out)


def init_qcritic_params(key, dim_obs, dim_action, dims_hidden=(64, 64)):
    """Logical (unpadded) params: [(W1,b1), (W2,b2), (W3,b3)]."""
    n_neurons = (dim_obs + dim_action,) + tuple(dims_hidden) + (1,)
    params = []
    keys = jax.random.split(key, len(n_neurons) - 1)
    for k, d_in, d_out in zip(keys, n_neurons[:-1], n_neurons[1:]):
        w = xavier_uniform(k, d_in, d_out)
        b = jnp.zeros((d_out,), jnp.float32)
        params.append((w, b))
    return params


def pad_qcritic_params(params, dim_obs, dim_action):
    """One-time prep (no per-call reshaping):
       * layer-1 weight split into obs/action row blocks, each padded to 128
         rows on the contraction dim, packed vertically -> (Dop+Dap, H1p)
       * W2 padded to (H1p, H2p); W3 padded to (H2p, 8)  [narrow output tile]
       * b1/b2/b3 stacked into a single (8, max(H1p,H2p)) bias block.
    """
    (w1, b1), (w2, b2), (w3, b3) = params
    H1, H2, OUT = w1.shape[1], w2.shape[1], w3.shape[1]
    H1p, H2p = _round_up(H1, _LANE), _round_up(H2, _LANE)
    Op = _round_up(OUT, _SUBLANE)                 # 8-lane output tile
    Dop = _round_up(dim_obs, _LANE)
    Dap = _round_up(dim_action, _LANE)

    def pad2(a, r, c):
        return jnp.pad(a, ((0, r - a.shape[0]), (0, c - a.shape[1])))

    w1o = pad2(w1[:dim_obs, :], Dop, H1p)          # (Dop, H1p)
    w1a = pad2(w1[dim_obs:, :], Dap, H1p)          # (Dap, H1p)
    w1p = jnp.concatenate([w1o, w1a], axis=0)      # (Dop+Dap, H1p)
    w2p = pad2(w2, H1p, H2p)                       # (H1p, H2p)
    w3p = pad2(w3, H2p, Op)                        # (H2p, 8)

    bw = max(H1p, H2p)
    bias = jnp.zeros((_SUBLANE, bw), jnp.float32)
    bias = bias.at[0, :H1].set(b1)
    bias = bias.at[1, :H2].set(b2)
    bias = bias.at[2, :OUT].set(b3)
    return (w1p, w2p, w3p, bias)


# --------------------------------------------------------------------------
# Forward pass wrapper: one fused pallas_call, weights VMEM-resident
# --------------------------------------------------------------------------
@jax.jit
def qcritic_forward(obs, action, padded_params):
    obs = obs.astype(jnp.float32)
    action = action.astype(jnp.float32)
    w1, w2, w3, bias = padded_params

    B, d_obs = obs.shape
    _, d_act = action.shape
    Dop = _round_up(d_obs, _LANE)
    Dap = _round_up(d_act, _LANE)
    H1p = w1.shape[1]
    H2p = w2.shape[1]
    Op = w3.shape[1]
    assert w1.shape[0] == Dop + Dap

    # Batch tile: single step for tiny batches; otherwise split the batch into
    # >= 2 grid steps (both v7x TensorCores participate) with TB up to 2048
    # rows so fixed per-step grid overhead (~0.35 us) stays amortized.
    Bp = _round_up(B, _SUBLANE)
    if Bp <= 2 * _SUBLANE:
        TB = Bp
    else:
        TB = min(2048, _round_up(pl.cdiv(Bp, 2), _SUBLANE))
    nb = pl.cdiv(Bp, TB)

    resident = lambda i: (0, 0)   # constant block index -> stays in VMEM
    stream = lambda i: (i, 0)     # batch-tiled activations / output

    def kernel(obs_ref, act_ref, w1_ref, w2_ref, w3_ref, bias_ref, o_ref):
        # Pad activations to lane width in registers (no scratch round trip;
        # pad lanes are explicit zeros so NaN x 0 cannot occur).
        x_o = jnp.pad(obs_ref[...], ((0, 0), (0, Dop - d_obs)))
        x_a = jnp.pad(act_ref[...], ((0, 0), (0, Dap - d_act)))

        b1 = bias_ref[0:1, :H1p]
        b2 = bias_ref[1:2, :H2p]
        b3 = bias_ref[2:3, :Op]

        # Layer 1: x @ W1 == obs @ W1[:Dop] + action @ W1[Dop:]  (tile-aligned
        # sublane slices of the packed weight; two tiny MXU passes).
        h1 = (jnp.dot(x_o, w1_ref[0:Dop, :], preferred_element_type=jnp.float32)
              + jnp.dot(x_a, w1_ref[Dop:Dop + Dap, :],
                        preferred_element_type=jnp.float32)
              + b1)
        h1 = jnp.maximum(h1, 0.0)

        # Layer 2.
        h2 = jnp.dot(h1, w2_ref[...], preferred_element_type=jnp.float32) + b2
        h2 = jnp.maximum(h2, 0.0)

        # Output layer: narrow (TB, 8) tile -> 16x less writeback than 128 lanes.
        o_ref[...] = (jnp.dot(h2, w3_ref[...], preferred_element_type=jnp.float32)
                      + b3)

    flops = 2 * B * ((Dop + Dap) * H1p + H1p * H2p + H2p * Op)
    bytes_accessed = 4 * (obs.size + action.size + nb * TB * Op
                          + w1.size + w2.size + w3.size + bias.size)

    out = pl.pallas_call(
        kernel,
        out_shape=jax.ShapeDtypeStruct((nb * TB, Op), jnp.float32),
        grid_spec=pltpu.PrefetchScalarGridSpec(
            num_scalar_prefetch=0,
            grid=(nb,),
            in_specs=[
                pl.BlockSpec((TB, d_obs), stream),
                pl.BlockSpec((TB, d_act), stream),
                pl.BlockSpec(w1.shape, resident),
                pl.BlockSpec(w2.shape, resident),
                pl.BlockSpec(w3.shape, resident),
                pl.BlockSpec(bias.shape, resident),
            ],
            out_specs=pl.BlockSpec((TB, Op), stream),
        ),
        compiler_params=pltpu.CompilerParams(
            dimension_semantics=("parallel",),   # v7x: 2 TCs split the batch grid
        ),
        cost_estimate=pl.CostEstimate(
            flops=flops, transcendentals=0, bytes_accessed=bytes_accessed),
    )(obs, action, w1, w2, w3, bias)

    return out[:B, :1]


# --------------------------------------------------------------------------
# Pure-JAX reference
# --------------------------------------------------------------------------
def qcritic_reference(obs, action, params):
    x = jnp.concatenate([obs, action], axis=1).astype(jnp.float32)
    (w1, b1), (w2, b2), (w3, b3) = params
    x = jnp.maximum(x @ w1 + b1, 0.0)
    x = jnp.maximum(x @ w2 + b2, 0.0)
    return x @ w3 + b3


if __name__ == "__main__":
    key = jax.random.PRNGKey(0)
    k_obs, k_act, k_param = jax.random.split(key, 3)

    batch = 2
    dim_obs = 12
    dim_action = 4
    dims_hidden = (64, 64)

    obs = jax.random.normal(k_obs, (batch, dim_obs), jnp.float32)
    action = jax.random.normal(k_act, (batch, dim_action), jnp.float32)

    params = init_qcritic_params(k_param, dim_obs, dim_action, dims_hidden)
    padded_params = pad_qcritic_params(params, dim_obs, dim_action)  # one-time

    q = qcritic_forward(obs, action, padded_params)
    q = jax.block_until_ready(q)

    q_ref = qcritic_reference(obs, action, params)
    assert q.shape == (batch, 1), q.shape
    assert jnp.allclose(q, q_ref, atol=1e-5, rtol=1e-5), (q, q_ref)

    print("KERNEL_OK")
</pallas_src>

<mosaic_0001>
module attributes {stable_mosaic.version = 11 : i64} {
  func.func @kernel(%arg0: i32, %arg1: memref<8x12xf32, #tpu.memory_space<vmem>>, %arg2: memref<8x4xf32, #tpu.memory_space<vmem>>, %arg3: memref<256x128xf32, #tpu.memory_space<vmem>>, %arg4: memref<128x128xf32, #tpu.memory_space<vmem>>, %arg5: memref<128x8xf32, #tpu.memory_space<vmem>>, %arg6: memref<8x128xf32, #tpu.memory_space<vmem>>, %arg7: memref<8x8xf32, #tpu.memory_space<vmem>>) attributes {dimension_semantics = [#tpu.dimension_semantics<parallel>], iteration_bounds = array<i64: 1>, scalar_prefetch = 0 : i64, scratch_operands = 0 : i64, tpu.core_type = #tpu.core_type<tc>, window_params = [{transform_indices = @transform_0, window_bounds = array<i64: 8, 12>}, {transform_indices = @transform_1, window_bounds = array<i64: 8, 4>}, {pipeline_mode = #tpu.pipeline_mode<synchronous>, transform_indices = @transform_2, window_bounds = array<i64: 256, 128>}, {pipeline_mode = #tpu.pipeline_mode<synchronous>, transform_indices = @transform_3, window_bounds = array<i64: 128, 128>}, {pipeline_mode = #tpu.pipeline_mode<synchronous>, transform_indices = @transform_4, window_bounds = array<i64: 128, 8>}, {pipeline_mode = #tpu.pipeline_mode<synchronous>, transform_indices = @transform_5, window_bounds = array<i64: 8, 128>}, {transform_indices = @transform_6, window_bounds = array<i64: 8, 8>}]} {
    %c0 = arith.constant 0 : index
    %c0_0 = arith.constant 0 : index
    %0 = vector.load %arg1[%c0, %c0_0] : memref<8x12xf32, #tpu.memory_space<vmem>>, vector<8x12xf32>
    %c0_i32 = arith.constant 0 : i32
    %1 = arith.sitofp %c0_i32 : i32 to f32
    %2 = vector.broadcast %1 : f32 to vector<8x116xf32>
    %3 = tpu.concatenate %0, %2 in 1 : vector<8x12xf32>, vector<8x116xf32> -> vector<8x128xf32>
    %c0_1 = arith.constant 0 : index
    %c0_2 = arith.constant 0 : index
    %4 = vector.load %arg2[%c0_1, %c0_2] : memref<8x4xf32, #tpu.memory_space<vmem>>, vector<8x4xf32>
    %c0_i32_3 = arith.constant 0 : i32
    %5 = arith.sitofp %c0_i32_3 : i32 to f32
    %6 = vector.broadcast %5 : f32 to vector<8x124xf32>
    %7 = tpu.concatenate %4, %6 in 1 : vector<8x4xf32>, vector<8x124xf32> -> vector<8x128xf32>
    %c0_4 = arith.constant 0 : index
    %c0_5 = arith.constant 0 : index
    %8 = vector.load %arg6[%c0_4, %c0_5] : memref<8x128xf32, #tpu.memory_space<vmem>>, vector<1x128xf32>
    %c1 = arith.constant 1 : index
    %c0_6 = arith.constant 0 : index
    %9 = vector.load %arg6[%c1, %c0_6] : memref<8x128xf32, #tpu.memory_space<vmem>>, vector<1x128xf32>
    %c2 = arith.constant 2 : index
    %c0_7 = arith.constant 0 : index
    %10 = vector.load %arg6[%c2, %c0_7] : memref<8x128xf32, #tpu.memory_space<vmem>>, vector<1x8xf32>
    %c0_8 = arith.constant 0 : index
    %c0_9 = arith.constant 0 : index
    %11 = vector.load %arg3[%c0_8, %c0_9] : memref<256x128xf32, #tpu.memory_space<vmem>>, vector<128x128xf32>
    %cst = arith.constant dense<0.000000e+00> : vector<8x128xf32>
    %12 = tpu.matmul %3, %11, %cst {dimension_numbers = #tpu.dot_dimension_numbers<[1], [0], [0], [1], [0, 0, 1, 1], [], []>} : vector<8x128xf32>, vector<128x128xf32>, vector<8x128xf32> -> vector<8x128xf32>
    %c128 = arith.constant 128 : index
    %c0_10 = arith.constant 0 : index
    %13 = vector.load %arg3[%c128, %c0_10] : memref<256x128xf32, #tpu.memory_space<vmem>>, vector<128x128xf32>
    %cst_11 = arith.constant dense<0.000000e+00> : vector<8x128xf32>
    %14 = tpu.matmul %7, %13, %cst_11 {dimension_numbers = #tpu.dot_dimension_numbers<[1], [0], [0], [1], [0, 0, 1, 1], [], []>} : vector<8x128xf32>, vector<128x128xf32>, vector<8x128xf32> -> vector<8x128xf32>
    %15 = arith.addf %12, %14 : vector<8x128xf32>
    %16 = vector.broadcast %8 : vector<1x128xf32> to vector<8x128xf32>
    %17 = arith.addf %15, %16 : vector<8x128xf32>
    %cst_12 = arith.constant 0.000000e+00 : f32
    %18 = vector.broadcast %cst_12 : f32 to vector<8x128xf32>
    %19 = arith.maximumf %17, %18 : vector<8x128xf32>
    %c0_13 = arith.constant 0 : index
    %c0_14 = arith.constant 0 : index
    %20 = vector.load %arg4[%c0_13, %c0_14] : memref<128x128xf32, #tpu.memory_space<vmem>>, vector<128x128xf32>
    %cst_15 = arith.constant dense<0.000000e+00> : vector<8x128xf32>
    %21 = tpu.matmul %19, %20, %cst_15 {dimension_numbers = #tpu.dot_dimension_numbers<[1], [0], [0], [1], [0, 0, 1, 1], [], []>} : vector<8x128xf32>, vector<128x128xf32>, vector<8x128xf32> -> vector<8x128xf32>
    %22 = vector.broadcast %9 : vector<1x128xf32> to vector<8x128xf32>
    %23 = arith.addf %21, %22 : vector<8x128xf32>
    %cst_16 = arith.constant 0.000000e+00 : f32
    %24 = vector.broadcast %cst_16 : f32 to vector<8x128xf32>
    %25 = arith.maximumf %23, %24 : vector<8x128xf32>
    %c0_17 = arith.constant 0 : index
    %c0_18 = arith.constant 0 : index
    %26 = vector.load %arg5[%c0_17, %c0_18] : memref<128x8xf32, #tpu.memory_space<vmem>>, vector<128x8xf32>
    %cst_19 = arith.constant dense<0.000000e+00> : vector<8x8xf32>
    %27 = tpu.matmul %25, %26, %cst_19 {dimension_numbers = #tpu.dot_dimension_numbers<[1], [0], [0], [1], [0, 0, 1, 1], [], []>} : vector<8x128xf32>, vector<128x8xf32>, vector<8x8xf32> -> vector<8x8xf32>
    %28 = vector.broadcast %10 : vector<1x8xf32> to vector<8x8xf32>
    %29 = arith.addf %27, %28 : vector<8x8xf32>
    %c0_20 = arith.constant 0 : index
    %c0_21 = arith.constant 0 : index
    %30 = vector.load %arg7[%c0_20, %c0_21] : memref<8x8xf32, #tpu.memory_space<vmem>>, vector<8x8xf32>
    tpu.vector_store %arg7[%c0_20, %c0_21], %29 {strides = array<i32>} : memref<8x8xf32, #tpu.memory_space<vmem>>, vector<8x8xf32>,
    return
  }
  func.func @transform_0(%arg0: i32) -> (i32, i32) {
    %c0_i32 = arith.constant 0 : i32
    %c0_i32_0 = arith.constant 0 : i32
    return %arg0, %c0_i32 : i32, i32
  }
  func.func @transform_1(%arg0: i32) -> (i32, i32) {
    %c0_i32 = arith.constant 0 : i32
    %c0_i32_0 = arith.constant 0 : i32
    return %arg0, %c0_i32 : i32, i32
  }
  func.func @transform_2(%arg0: i32) -> (i32, i32) {
    %c0_i32 = arith.constant 0 : i32
    %c0_i32_0 = arith.constant 0 : i32
    %c0_i32_1 = arith.constant 0 : i32
    return %c0_i32, %c0_i32_0 : i32, i32
  }
  func.func @transform_3(%arg0: i32) -> (i32, i32) {
    %c0_i32 = arith.constant 0 : i32
    %c0_i32_0 = arith.constant 0 : i32
    %c0_i32_1 = arith.constant 0 : i32
    return %c0_i32, %c0_i32_0 : i32, i32
  }
  func.func @transform_4(%arg0: i32) -> (i32, i32) {
    %c0_i32 = arith.constant 0 : i32
    %c0_i32_0 = arith.constant 0 : i32
    %c0_i32_1 = arith.constant 0 : i32
    return %c0_i32, %c0_i32_0 : i32, i32
  }
  func.func @transform_5(%arg0: i32) -> (i32, i32) {
    %c0_i32 = arith.constant 0 : i32
    %c0_i32_0 = arith.constant 0 : i32
    %c0_i32_1 = arith.constant 0 : i32
    return %c0_i32, %c0_i32_0 : i32, i32
  }
  func.func @transform_6(%arg0: i32) -> (i32, i32) {
    %c0_i32 = arith.constant 0 : i32
    %c0_i32_0 = arith.constant 0 : i32
    return %arg0, %c0_i32 : i32, i32
  }
}

</mosaic_0001>

<bundles_post_ra>
// kernel: qcritic_forward.1
= control target key start
LH: loop header
LB: loop body
LE: loop exit
PB: predicated region body
PF: predicated region fallthrough
CT: control target
= control target key end

     0   :  { %11 = vsyncpa [#allocation3], 0  ;;  %s652_s21 = smov [#allocation2]   ;;  %s881_s0 = inlined_call_operand.vmem [shape: f32[2,12], index: 0, kind: input, shape index: {}]   ;;  %s882_s1 = inlined_call_operand.vmem [shape: f32[2,4], index: 1, kind: input, shape index: {}]   ;;  %s883_s2 = inlined_call_operand.hbm [shape: f32[256,128], index: 2, kind: input, shape index: {}]   ;;  %s884_s3 = inlined_call_operand.vmem [shape: f32[128,128], index: 3, kind: input, shape index: {}]   ;;  %s885_s4 = inlined_call_operand.vmem [shape: f32[128,8], index: 4, kind: input, shape index: {}]   ;;  %s886_s5 = inlined_call_operand.vmem [shape: f32[8,128], index: 5, kind: input, shape index: {}]   ;;  %s887_s6 = inlined_call_operand.vmem [shape: f32[8,8], index: 6, kind: output, shape index: {}]  }
   0x1   :  { %s21_s22 = sshll.u32 %s652_s21, 4  ;;  %s22_s22 = int_to_ptr.vmem [resolvable:$true] %s21_s22 }
   0x2   :  { %s638_s23 = scalar_lea.vmem %s22_s22, 4096  ;;  %p643_p1 = scmp.lt.s32.totalorder %s22_s22, %s22_s22 }
   0x3   :  { %p639_p0 = scmp.ne.s32.totalorder %s22_s22, %s638_s23  ;;  %p644_p2 = scmp.lt.s32.totalorder %s638_s23, %s638_s23 }
   0x5   :  { %p645_p3 = por %p644_p2, %p643_p1 }
   0x7   :  { %p646_p4 = pnand %p645_p3, %p639_p0 }
   0x9   :  { %649 = shalt.err (!%p646_p4)
}
   0xa   :  { %s653_s24 = smov 128   ;;  %s654_s25 = smov 8  }
   0xb   :  { %27 = dma.hbm_to_vmem [thread:$0]  %s883_s2, 4096, %s22_s22, [#allocation3], %s653_s24, %s653_s24, %s654_s25  }
   0xc   :  { %650 = dma.done.wait [#allocation3], 4096  }
   0xd   :  { %651 = vsyncadd [#allocation3], 4294963200  ;;  %v655_v0 = vmov 0.0   ;;  %vm656_vm0 = vmmov 0   ;;  %v77_v1 = vld [vmem:[#allocation2 + $0xf8] sm:$0xff]  ;;  %v76_v3 = vld [vmem:[#allocation2 + $0xf0] sm:$0xff] }
   0xe   :  { %485 = vmatprep.subr.mxu0 %v655_v0  ;;  %520 = vmatprep.subr.mxu1 %v655_v0  ;;  %v61_v2 = vld [vmem:[#allocation2 + $0x78] sm:$0xff]  ;;  %v60_v4 = vld [vmem:[#allocation2 + $0x70] sm:$0xff]  ;;  %v75_v5 = vld [vmem:[#allocation2 + $0xe8] sm:$0xff]  ;;  %vm41_vm1 = vcmask 31744   ;;  %vm38_vm2 = vcmask 97280   ;;  %vm405_vm3 = vcmask 64512  }
   0xf   :  { %517 = vmatprep.mubr.msk.f32.mxu0 %vm656_vm0, %v655_v0  ;;  %552 = vmatprep.mubr.msk.f32.mxu1 %vm656_vm0, %v655_v0  ;;  %v59_v6 = vld [vmem:[#allocation2 + $0x68] sm:$0xff]  ;;  %v74_v7 = vld [vmem:[#allocation2 + $0xe0] sm:$0xff]  ;;  %v73_v9 = vld [vmem:[#allocation2 + $0xd8] sm:$0xff] }
  0x10   :  { %486 = vmatpush3.msra.mxu0 %v77_v1  ;;  %521 = vmatpush3.msra.mxu1 %v61_v2  ;;  %v58_v8 = vld [vmem:[#allocation2 + $0x60] sm:$0xff]  ;;  %v57_v10 = vld [vmem:[#allocation2 + $0x58] sm:$0xff]  ;;  %v72_v11 = vld [vmem:[#allocation2 + $0xd0] sm:$0xff] }
  0x11   :  { %487 = vmatprep.subr.mxu0 %v655_v0  ;;  %522 = vmatprep.subr.mxu1 %v655_v0  ;;  %v56_v12 = vld [vmem:[#allocation2 + $0x50] sm:$0xff]  ;;  %v71_v13 = vld [vmem:[#allocation2 + $0xc8] sm:$0xff]  ;;  %v70_v15 = vld [vmem:[#allocation2 + $0xc0] sm:$0xff] }
  0x12   :  { %488 = vmatpush3.msra.mxu0 %v76_v3  ;;  %523 = vmatpush3.msra.mxu1 %v60_v4  ;;  %v55_v14 = vld [vmem:[#allocation2 + $0x48] sm:$0xff]  ;;  %v54_v16 = vld [vmem:[#allocation2 + $0x40] sm:$0xff]  ;;  %v69_v17 = vld [vmem:[#allocation2 + $0xb8] sm:$0xff] }
  0x13   :  { %489 = vmatprep.subr.mxu0 %v655_v0  ;;  %524 = vmatprep.subr.mxu1 %v655_v0  ;;  %v53_v18 = vld [vmem:[#allocation2 + $0x38] sm:$0xff]  ;;  %v68_v19 = vld [vmem:[#allocation2 + $0xb0] sm:$0xff]  ;;  %v67_v21 = vld [vmem:[#allocation2 + $0xa8] sm:$0xff] }
  0x14   :  { %490 = vmatpush3.msra.mxu0 %v75_v5  ;;  %525 = vmatpush3.msra.mxu1 %v59_v6  ;;  %v52_v20 = vld [vmem:[#allocation2 + $0x30] sm:$0xff]  ;;  %v51_v22 = vld [vmem:[#allocation2 + $0x28] sm:$0xff]  ;;  %v66_v23 = vld [vmem:[#allocation2 + $0xa0] sm:$0xff] }
  0x15   :  { %491 = vmatprep.subr.mxu0 %v655_v0  ;;  %526 = vmatprep.subr.mxu1 %v655_v0  ;;  %v50_v24 = vld [vmem:[#allocation2 + $0x20] sm:$0xff]  ;;  %v65_v25 = vld [vmem:[#allocation2 + $0x98] sm:$0xff]  ;;  %v64_v27 = vld [vmem:[#allocation2 + $0x90] sm:$0xff] }
  0x16   :  { %492 = vmatpush3.msra.mxu0 %v74_v7  ;;  %527 = vmatpush3.msra.mxu1 %v58_v8  ;;  %v49_v26 = vld [vmem:[#allocation2 + $0x18] sm:$0xff]  ;;  %v48_v28 = vld [vmem:[#allocation2 + $0x10] sm:$0xff]  ;;  %v63_v29 = vld [vmem:[#allocation2 + $0x88] sm:$0xff] }
  0x17   :  { %493 = vmatprep.subr.mxu0 %v655_v0  ;;  %528 = vmatprep.subr.mxu1 %v655_v0  ;;  %v47_v30 = vld [vmem:[#allocation2 + $0x8] sm:$0xff]  ;;  %v62_v31 = vld [vmem:[#allocation2 + $0x80] sm:$0xff]  ;;  %v239_v35 = vld [vmem:[%s884_s3 + $0x78] sm:$0xff] }
  0x18   :  { %494 = vmatpush3.msra.mxu0 %v73_v9  ;;  %529 = vmatpush3.msra.mxu1 %v57_v10  ;;  %v46_v32 = vld [vmem:[#allocation2] sm:$0xff]  ;;  %v238_v36 = vld [vmem:[%s884_s3 + $0x70] sm:$0xff]  ;;  %v237_v37 = vld [vmem:[%s884_s3 + $0x68] sm:$0xff] }
  0x19   :  { %495 = vmatprep.subr.mxu0 %v655_v0  ;;  %530 = vmatprep.subr.mxu1 %v655_v0  ;;  %v40_v33 = vld [vmem:[%s882_s1] sm:$0xff]  ;;  %v235_v39 = vld [vmem:[%s884_s3 + $0x58] sm:$0xff]  ;;  %v234_v40 = vld [vmem:[%s884_s3 + $0x50] sm:$0xff] }
  0x1a   :  { %496 = vmatpush3.msra.mxu0 %v72_v11  ;;  %531 = vmatpush3.msra.mxu1 %v56_v12  ;;  %v37_v34 = vld [vmem:[%s881_s0] sm:$0xff]  ;;  %v233_v41 = vld [vmem:[%s884_s3 + $0x48] sm:$0xff]  ;;  %v231_v43 = vld [vmem:[%s884_s3 + $0x38] sm:$0xff] }
  0x1b   :  { %497 = vmatprep.subr.mxu0 %v655_v0  ;;  %532 = vmatprep.subr.mxu1 %v655_v0  ;;  %v236_v38 = vld [vmem:[%s884_s3 + $0x60] sm:$0xff]  ;;  %v230_v44 = vld [vmem:[%s884_s3 + $0x30] sm:$0xff]  ;;  %v229_v45 = vld [vmem:[%s884_s3 + $0x28] sm:$0xff] }
  0x1c   :  { %498 = vmatpush3.msra.mxu0 %v71_v13  ;;  %533 = vmatpush3.msra.mxu1 %v55_v14  ;;  %v232_v42 = vld [vmem:[%s884_s3 + $0x40] sm:$0xff]  ;;  %v227_v47 = vld [vmem:[%s884_s3 + $0x18] sm:$0xff]  ;;  %v226_v48 = vld [vmem:[%s884_s3 + $0x10] sm:$0xff] }
  0x1d   :  { %499 = vmatprep.subr.mxu0 %v655_v0  ;;  %534 = vmatprep.subr.mxu1 %v655_v0  ;;  %v228_v46 = vld [vmem:[%s884_s3 + $0x20] sm:$0xff]  ;;  %v225_v49 = vld [vmem:[%s884_s3 + $0x8] sm:$0xff]  ;;  %v330_v51 = vld [vmem:[%s885_s4 + $0x78] sm:$0xff] }
  0x1e   :  { %500 = vmatpush3.msra.mxu0 %v70_v15  ;;  %535 = vmatpush3.msra.mxu1 %v54_v16  ;;  %v224_v50 = vld [vmem:[%s884_s3] sm:$0xff]  ;;  %v329_v52 = vld [vmem:[%s885_s4 + $0x70] sm:$0xff]  ;;  %v328_v53 = vld [vmem:[%s885_s4 + $0x68] sm:$0xff] }
  0x1f   :  { %501 = vmatprep.subr.mxu0 %v655_v0  ;;  %536 = vmatprep.subr.mxu1 %v655_v0  ;;  %v327_v54 = vld [vmem:[%s885_s4 + $0x60] sm:$0xff]  ;;  %v326_v55 = vld [vmem:[%s885_s4 + $0x58] sm:$0xff]  ;;  %v325_v56 = vld [vmem:[%s885_s4 + $0x50] sm:$0xff] }
  0x20   :  { %502 = vmatpush3.msra.mxu0 %v69_v17  ;;  %537 = vmatpush3.msra.mxu1 %v53_v18  ;;  %v324_v57 = vld [vmem:[%s885_s4 + $0x48] sm:$0xff]  ;;  %v323_v58 = vld [vmem:[%s885_s4 + $0x40] sm:$0xff]  ;;  %v322_v59 = vld [vmem:[%s885_s4 + $0x38] sm:$0xff] }
  0x21   :  { %503 = vmatprep.subr.mxu0 %v655_v0  ;;  %538 = vmatprep.subr.mxu1 %v655_v0  ;;  %v321_v60 = vld [vmem:[%s885_s4 + $0x30] sm:$0xff]  ;;  %v320_v61 = vld [vmem:[%s885_s4 + $0x28] sm:$0xff]  ;;  %v319_v62 = vld [vmem:[%s885_s4 + $0x20] sm:$0xff] }
  0x22   :  { %504 = vmatpush3.msra.mxu0 %v68_v19  ;;  %539 = vmatpush3.msra.mxu1 %v52_v20  ;;  %v318_v63 = vld [vmem:[%s885_s4 + $0x18] sm:$0xff]  ;;  %v414_v2 = vld [vmem:[%s886_s5] ss:$0 sm:$0xff]  ;;  %v317_v9 = vld [vmem:[%s885_s4 + $0x10] sm:$0xff] }
  0x23   :  { %505 = vmatprep.subr.mxu0 %v655_v0  ;;  %540 = vmatprep.subr.mxu1 %v655_v0  ;;  %v316_v10 = vld [vmem:[%s885_s4 + $0x8] sm:$0xff]  ;;  %v315_v11 = vld [vmem:[%s885_s4] sm:$0xff] }
  0x24   :  { %506 = vmatpush3.msra.mxu0 %v67_v21  ;;  %541 = vmatpush3.msra.mxu1 %v51_v22  ;;  %v415_v12 = vld [vmem:[%s886_s5 + $0x1] ss:$0 sm:$0xff]  ;;  %v416_v17 = vld [vmem:[%s886_s5 + $0x2] ss:$0 sm:$0xff] }
  0x25   :  { %507 = vmatprep.subr.mxu0 %v655_v0  ;;  %542 = vmatprep.subr.mxu1 %v655_v0 }
  0x26   :  { %508 = vmatpush3.msra.mxu0 %v66_v23  ;;  %543 = vmatpush3.msra.mxu1 %v50_v24 }
  0x27   :  { %509 = vmatprep.subr.mxu0 %v655_v0  ;;  %544 = vmatprep.subr.mxu1 %v655_v0 }
  0x28   :  { %510 = vmatpush3.msra.mxu0 %v65_v25  ;;  %545 = vmatpush3.msra.mxu1 %v49_v26 }
  0x29   :  { %511 = vmatprep.subr.mxu0 %v655_v0  ;;  %546 = vmatprep.subr.mxu1 %v655_v0 }
  0x2a   :  { %512 = vmatpush3.msra.mxu0 %v64_v27  ;;  %547 = vmatpush3.msra.mxu1 %v48_v28 }
  0x2b   :  { %513 = vmatprep.subr.mxu0 %v655_v0  ;;  %548 = vmatprep.subr.mxu1 %v655_v0 }
  0x2c   :  { %514 = vmatpush3.msra.mxu0 %v63_v29  ;;  %549 = vmatpush3.msra.mxu1 %v47_v30 }
  0x2d   :  { %515 = vmatprep.subr.mxu0 %v655_v0  ;;  %550 = vmatprep.subr.mxu1 %v655_v0 }
  0x2e   :  { %516 = vmatpush3.msra.mxu0 %v62_v31  ;;  %551 = vmatpush3.msra.mxu1 %v46_v32 }
  0x2f   :  { %518 = vmatmul.mubr.msk.f32.vlgmr.msra.gmra.mxu0 %vm41_vm1, %v40_v33  ;;  %553 = vmatmul.mubr.msk.f32.vlgmr.msra.gmra.mxu1 %vm38_vm2, %v37_v34 }
  0x30   :  { %555 = vmatprep.subr.mxu0 %v655_v0  ;;  %587 = vmatprep.mubr.msk.f32.mxu0 %vm656_vm0, %v655_v0 }
  0x31   :  { %556 = vmatpush3.msra.mxu0 %v239_v35  ;;  %590 = vmatprep.subr.mxu1 %v655_v0 }
  0x32   :  { %557 = vmatprep.subr.mxu0 %v655_v0  ;;  %622 = vmatprep.mubr.msk.f32.mxu1 %vm656_vm0, %v655_v0 }
  0x33   :  { %558 = vmatpush3.msra.mxu0 %v238_v36  ;;  %591 = vmatpush3.msra.mxu1 %v330_v51 }
  0x34   :  { %559 = vmatprep.subr.mxu0 %v655_v0  ;;  %592 = vmatprep.subr.mxu1 %v655_v0 }
  0x35   :  { %560 = vmatpush3.msra.mxu0 %v237_v37  ;;  %593 = vmatpush3.msra.mxu1 %v329_v52 }
  0x36   :  { %561 = vmatprep.subr.mxu0 %v655_v0  ;;  %594 = vmatprep.subr.mxu1 %v655_v0 }
  0x37   :  { %562 = vmatpush3.msra.mxu0 %v236_v38  ;;  %595 = vmatpush3.msra.mxu1 %v328_v53 }
  0x38   :  { %563 = vmatprep.subr.mxu0 %v655_v0  ;;  %596 = vmatprep.subr.mxu1 %v655_v0 }
  0x39   :  { %564 = vmatpush3.msra.mxu0 %v235_v39  ;;  %597 = vmatpush3.msra.mxu1 %v327_v54 }
  0x3a   :  { %565 = vmatprep.subr.mxu0 %v655_v0  ;;  %598 = vmatprep.subr.mxu1 %v655_v0 }
  0x3b   :  { %566 = vmatpush3.msra.mxu0 %v234_v40  ;;  %599 = vmatpush3.msra.mxu1 %v326_v55 }
  0x3c   :  { %567 = vmatprep.subr.mxu0 %v655_v0  ;;  %600 = vmatprep.subr.mxu1 %v655_v0 }
  0x3d   :  { %568 = vmatpush3.msra.mxu0 %v233_v41  ;;  %601 = vmatpush3.msra.mxu1 %v325_v56 }
  0x3e   :  { %569 = vmatprep.subr.mxu0 %v655_v0  ;;  %602 = vmatprep.subr.mxu1 %v655_v0 }
  0x3f   :  { %570 = vmatpush3.msra.mxu0 %v232_v42  ;;  %603 = vmatpush3.msra.mxu1 %v324_v57 }
  0x40   :  { %571 = vmatprep.subr.mxu0 %v655_v0  ;;  %604 = vmatprep.subr.mxu1 %v655_v0 }
  0x41   :  { %572 = vmatpush3.msra.mxu0 %v231_v43  ;;  %605 = vmatpush3.msra.mxu1 %v323_v58 }
  0x42   :  { %573 = vmatprep.subr.mxu0 %v655_v0  ;;  %606 = vmatprep.subr.mxu1 %v655_v0 }
  0x43   :  { %574 = vmatpush3.msra.mxu0 %v230_v44  ;;  %607 = vmatpush3.msra.mxu1 %v322_v59 }
  0x44   :  { %575 = vmatprep.subr.mxu0 %v655_v0  ;;  %608 = vmatprep.subr.mxu1 %v655_v0 }
  0x45   :  { %576 = vmatpush3.msra.mxu0 %v229_v45  ;;  %609 = vmatpush3.msra.mxu1 %v321_v60 }
  0x46   :  { %577 = vmatprep.subr.mxu0 %v655_v0  ;;  %610 = vmatprep.subr.mxu1 %v655_v0 }
  0x47   :  { %578 = vmatpush3.msra.mxu0 %v228_v46  ;;  %611 = vmatpush3.msra.mxu1 %v320_v61 }
  0x48   :  { %579 = vmatprep.subr.mxu0 %v655_v0  ;;  %612 = vmatprep.subr.mxu1 %v655_v0 }
  0x49   :  { %580 = vmatpush3.msra.mxu0 %v227_v47  ;;  %613 = vmatpush3.msra.mxu1 %v319_v62 }
  0x4a   :  { %581 = vmatprep.subr.mxu0 %v655_v0  ;;  %614 = vmatprep.subr.mxu1 %v655_v0 }
  0x4b   :  { %582 = vmatpush3.msra.mxu0 %v226_v48  ;;  %615 = vmatpush3.msra.mxu1 %v318_v63 }
  0x4c   :  { %583 = vmatprep.subr.mxu0 %v655_v0  ;;  %616 = vmatprep.subr.mxu1 %v655_v0 }
  0x4d   :  { %584 = vmatpush3.msra.mxu0 %v225_v49  ;;  %617 = vmatpush3.msra.mxu1 %v317_v9 }
  0x4e   :  { %585 = vmatprep.subr.mxu0 %v655_v0  ;;  %618 = vmatprep.subr.mxu1 %v655_v0 }
  0x4f   :  { %586 = vmatpush3.msra.mxu0 %v224_v50  ;;  %619 = vmatpush3.msra.mxu1 %v316_v10 }
  0x50   :  { %620 = vmatprep.subr.mxu1 %v655_v0 }
  0x51   :  { %621 = vmatpush3.msra.mxu1 %v315_v11 }
  0xef   :  { %v144_v1 = vpop.f32.mrf.mxu0  ;;  %v214_v3 = vpop.f32.mrf.mxu1 }
  0xf0   :  { %v215_v4 = vadd.f32 %v214_v3, %v144_v1 }
  0xf1   :  { %v519_v5 = vpop.f32.mrf.mxu0  ;;  %v554_v6 = vpop.f32.mrf.mxu1 }
  0xf2   :  { %v222_v7 = vadd.f32 %v414_v2, %v215_v4 }
  0xf4   :  { %v223_v8 = vmax.f32 %v222_v7, 0.0 }
  0xf6   :  { %588 = vmatmul.mubr.f32.vlgmr.msra.gmra.mxu0 %v223_v8 }
 0x1b6   :  { %v310_v13 = vpop.f32.mrf.mxu0 }
 0x1b7   :  { %v311_v14 = vadd.f32 %v415_v12, %v310_v13 }
 0x1b8   :  { %v589_v15 = vpop.f32.mrf.mxu0 }
 0x1b9   :  { %v314_v16 = vmax.f32 %v311_v14, 0.0 }
 0x1bb   :  { %623 = vmatmul.mubr.f32.vlgmr.msra.gmra.mxu1 %v314_v16 }
 0x27b   :  { %v401_v18 = vpop.f32.mrf.mxu1 }
 0x27c   :  { %v402_v0 = vadd.f32 %v416_v17, %v401_v18 }
 0x27d   :  { %v624_v19 = vpop.f32.mrf.mxu1 }
 0x27e   :  { %406 = vst.msk [vmem:[%s887_s6] sm:$0xff] %vm405_vm3, %v402_v0 }
 0x27f   :  { %411 = vsyncpa [#allocation3], 1 }

</bundles_post_ra>
